<compile_context>
chip_gen: v7x
topology: tpu7x:2x2x1
jax: 0.10.0
libtpu: 0.0.40
codegen_flags: <defaults>
</compile_context>

<pallas_src>
import functools

import jax
import jax.numpy as jnp
from jax.experimental import pallas as pl
from jax.experimental.pallas import tpu as pltpu

BN_EPS = 1e-5
_MIB = 1024 * 1024


def _ac_kernel(x_ref, gamma_ref, beta_ref, w_ref, b_ref, o_ref,
               sum_ref, sumsq_ref, scale_ref, shift_ref, pooled_ref,
               *, n_elems, hw, needs_mask):
    # x_ref:        [B, C, T]  hw tile of x (native dtype)
    # gamma/beta:   [1, C, 1]  f32
    # w_ref:        [C, NC]    f32 (fc weight, transposed)
    # b_ref:        [1, NC]    f32
    # o_ref:        [B, NC]    f32
    sweep = pl.program_id(0)
    i = pl.program_id(1)
    n_tiles = pl.num_programs(1)

    x = x_ref[...].astype(jnp.float32)          # per-tile upcast in vregs
    B, C, T = x.shape
    inv_n = 1.0 / float(n_elems)                # trace-time constants
    inv_hw = 1.0 / float(hw)

    if needs_mask:                              # tail block: zero invalid lanes
        lane = jax.lax.broadcasted_iota(jnp.int32, (B, C, T), 2)
        mask = (lane + i * T) < hw
        x = jnp.where(mask, x, 0.0)
    else:
        mask = None

    # ---- sweep 0: streamed one-pass batch statistics ------------------------
    @pl.when(sweep == 0)
    def _stats():
        @pl.when(i == 0)
        def _init():
            sum_ref[...] = jnp.zeros_like(sum_ref)
            sumsq_ref[...] = jnp.zeros_like(sumsq_ref)

        part = jnp.sum(x, axis=2, keepdims=True)            # [B, C, 1] lane reduce
        part_sq = jnp.sum(x * x, axis=2, keepdims=True)
        sum_ref[...] += jnp.sum(part, axis=0, keepdims=True)      # [1, C, 1]
        sumsq_ref[...] += jnp.sum(part_sq, axis=0, keepdims=True)

        @pl.when(i == n_tiles - 1)
        def _finalize_stats():
            mean = sum_ref[...] * inv_n                      # [1, C, 1]
            # One-pass E[x^2]-mean^2 (f32); clamp guards tiny negative variance.
            var = jnp.maximum(sumsq_ref[...] * inv_n - mean * mean, 0.0)
            inv_std = jax.lax.rsqrt(var + BN_EPS)            # EUP
            scale = gamma_ref[...] * inv_std
            scale_ref[...] = scale
            shift_ref[...] = beta_ref[...] - mean * scale

    # ---- sweep 1: fused normalize + ReLU + spatial pooling (+ FC epilogue) ---
    @pl.when(sweep == 1)
    def _pool():
        @pl.when(i == 0)
        def _init():
            pooled_ref[...] = jnp.zeros_like(pooled_ref)

        xn = jnp.maximum(x * scale_ref[...] + shift_ref[...], 0.0)   # [B, C, T]
        if needs_mask:
            # padded lanes would contribute relu(shift) > 0 otherwise
            xn = jnp.where(mask, xn, 0.0)
        pooled_ref[...] += jnp.sum(xn, axis=2)                       # [B, C]

        @pl.when(i == n_tiles - 1)
        def _fc():
            pooled = pooled_ref[...] * inv_hw                        # [B, C]
            out = jnp.dot(pooled, w_ref[...],
                          preferred_element_type=jnp.float32)
            o_ref[...] = (out + b_ref[...]).astype(o_ref.dtype)


def _vmem_limit_bytes():
    """Per-generation scoped VMEM limit (v7x: 64 MiB/TC; v5e/v6e: 128 MiB)."""
    kind = ""
    try:
        kind = jax.devices()[0].device_kind.lower()
    except Exception:
        pass
    physical = 64 * _MIB if "v7" in kind else 128 * _MIB
    return max(32 * _MIB, min(physical - 16 * _MIB, 100 * _MIB))


def _pick_hw_tile(B, C, hw, itemsize, vmem_limit):
    """hw tile: whole array if x (plus f32 temps) fits the budget (single HBM
    pass), else ~4 MiB native-dtype blocks that are multiples of 128 lanes."""
    budget = int(0.75 * vmem_limit)

    def working_set(t):
        blk = B * C * t * itemsize
        blk_f32 = B * C * t * 4
        return 2 * blk + 3 * blk_f32        # double-buffered block + f32 temps

    if working_set(hw) <= budget:
        return hw                           # x stays VMEM-resident across sweeps

    target = 4 * _MIB                       # MiB-scale blocks: DMA >> step overhead
    per_lane = max(1, B * C * itemsize)
    tile = max(128, (target // per_lane) // 128 * 128)
    while tile > 128 and working_set(tile) > budget:
        tile = max(128, (tile // 2) // 128 * 128)
    return min(tile, hw)


def additional_classifier(x, gamma, beta, fc_w, fc_b, *, hw_tile=None):
    """Forward of AdditionalClassfier.

    x: [B, C, H, W] (any float dtype), fc_w: [NC, C], fc_b: [NC].
    Returns [B, NC] float32.  BatchNorm uses training-mode batch statistics.
    """
    B, C, H, W = x.shape
    NC = fc_w.shape[0]
    HW = H * W

    x_flat = x.reshape(B, C, HW)                       # free reshape, no transpose
    gamma3 = gamma.reshape(1, C, 1).astype(jnp.float32)
    beta3 = beta.reshape(1, C, 1).astype(jnp.float32)
    w_t = fc_w.T.astype(jnp.float32)                   # [C, NC]
    b2 = fc_b.reshape(1, NC).astype(jnp.float32)

    vmem_limit = _vmem_limit_bytes()
    tile = hw_tile if hw_tile is not None else _pick_hw_tile(
        B, C, HW, x.dtype.itemsize, vmem_limit)
    n_tiles = pl.cdiv(HW, tile)
    needs_mask = (HW % tile) != 0

    kernel = functools.partial(
        _ac_kernel, n_elems=B * HW, hw=HW, needs_mask=needs_mask)

    return pl.pallas_call(
        kernel,
        out_shape=jax.ShapeDtypeStruct((B, NC), jnp.float32),
        grid_spec=pltpu.PrefetchScalarGridSpec(
            num_scalar_prefetch=0,
            grid=(2, n_tiles),                          # (sweep, hw-tile)
            in_specs=[
                pl.BlockSpec((B, C, tile), lambda s, i: (0, 0, i)),   # x tile
                pl.BlockSpec((1, C, 1), lambda s, i: (0, 0, 0)),      # gamma
                pl.BlockSpec((1, C, 1), lambda s, i: (0, 0, 0)),      # beta
                pl.BlockSpec((C, NC), lambda s, i: (0, 0)),           # fc W^T
                pl.BlockSpec((1, NC), lambda s, i: (0, 0)),           # fc bias
            ],
            out_specs=pl.BlockSpec((B, NC), lambda s, i: (0, 0)),
            scratch_shapes=[
                pltpu.VMEM((1, C, 1), jnp.float32),     # sum
                pltpu.VMEM((1, C, 1), jnp.float32),     # sum of squares
                pltpu.VMEM((1, C, 1), jnp.float32),     # scale = gamma * inv_std
                pltpu.VMEM((1, C, 1), jnp.float32),     # shift = beta - mean*scale
                pltpu.VMEM((B, C), jnp.float32),        # pooled accumulator
            ],
        ),
        compiler_params=pltpu.CompilerParams(
            # NOTE: on v7x the hw-tile axis could be sharded across the 2 TCs
            # with per-core partial accumulators; single-TC accumulator here.
            dimension_semantics=("arbitrary", "arbitrary"),
            vmem_limit_bytes=vmem_limit),
    )(x_flat, gamma3, beta3, w_t, b2)


def _reference(x, gamma, beta, fc_w, fc_b):
    # Pure-JAX reference mirroring the PyTorch forward (training-mode BN).
    B, C, H, W = x.shape
    xf = x.astype(jnp.float32)
    mean = jnp.mean(xf, axis=(0, 2, 3))
    var = jnp.mean((xf - mean.reshape(1, C, 1, 1)) ** 2, axis=(0, 2, 3))
    xn = (xf - mean.reshape(1, C, 1, 1)) / jnp.sqrt(var.reshape(1, C, 1, 1) + BN_EPS)
    xn = xn * gamma.reshape(1, C, 1, 1) + beta.reshape(1, C, 1, 1)
    xn = jnp.maximum(xn, 0.0)
    pooled = xn.mean(axis=2).mean(axis=2)               # [B, C]
    return pooled @ fc_w.T + fc_b


if __name__ == "__main__":
    key = jax.random.PRNGKey(0)
    B, C, H, W = 2, 4, 16, 16
    num_classes = 8

    k_x, k_w = jax.random.split(key)
    x = jax.random.normal(k_x, (B, C, H, W), dtype=jnp.float32)

    # Parameters mirror __init__: bn.weight=1, bn.bias=0, fc.bias=0
    gamma = jnp.ones((C,), dtype=jnp.float32)
    beta = jnp.zeros((C,), dtype=jnp.float32)
    fc_w = 0.1 * jax.random.normal(k_w, (num_classes, C), dtype=jnp.float32)
    fc_b = jnp.zeros((num_classes,), dtype=jnp.float32)

    out = jax.block_until_ready(additional_classifier(x, gamma, beta, fc_w, fc_b))
    ref = _reference(x, gamma, beta, fc_w, fc_b)
    assert out.shape == (B, num_classes)
    assert jnp.allclose(out, ref, atol=1e-4, rtol=1e-4), (out, ref)

    # Also exercise the streamed multi-tile path with a masked (ragged) tail.
    x2 = jax.random.normal(jax.random.PRNGKey(1), (B, C, 20, 20), dtype=jnp.float32)
    out2 = jax.block_until_ready(
        additional_classifier(x2, gamma, beta, fc_w, fc_b, hw_tile=128))
    ref2 = _reference(x2, gamma, beta, fc_w, fc_b)
    assert jnp.allclose(out2, ref2, atol=1e-4, rtol=1e-4), (out2, ref2)

    print("KERNEL_OK")
</pallas_src>

<mosaic_0001>
module attributes {stable_mosaic.version = 11 : i64} {
  func.func @_ac_kernel(%arg0: i32, %arg1: i32, %arg2: memref<2x4x256xf32, #tpu.memory_space<vmem>>, %arg3: memref<1x4x1xf32, #tpu.memory_space<vmem>>, %arg4: memref<1x4x1xf32, #tpu.memory_space<vmem>>, %arg5: memref<4x8xf32, #tpu.memory_space<vmem>>, %arg6: memref<1x8xf32, #tpu.memory_space<vmem>>, %arg7: memref<2x8xf32, #tpu.memory_space<vmem>>, %arg8: memref<1x4x1xf32, #tpu.memory_space<vmem>>, %arg9: memref<1x4x1xf32, #tpu.memory_space<vmem>>, %arg10: memref<1x4x1xf32, #tpu.memory_space<vmem>>, %arg11: memref<1x4x1xf32, #tpu.memory_space<vmem>>, %arg12: memref<2x4xf32, #tpu.memory_space<vmem>>) attributes {dimension_semantics = [#tpu.dimension_semantics<arbitrary>, #tpu.dimension_semantics<arbitrary>], iteration_bounds = array<i64: 2, 1>, scalar_prefetch = 0 : i64, scratch_operands = 5 : i64, tpu.core_type = #tpu.core_type<tc>, window_params = [{transform_indices = @transform_0, window_bounds = array<i64: 2, 4, 256>}, {pipeline_mode = #tpu.pipeline_mode<synchronous>, transform_indices = @transform_1, window_bounds = array<i64: 1, 4, 1>}, {pipeline_mode = #tpu.pipeline_mode<synchronous>, transform_indices = @transform_2, window_bounds = array<i64: 1, 4, 1>}, {pipeline_mode = #tpu.pipeline_mode<synchronous>, transform_indices = @transform_3, window_bounds = array<i64: 4, 8>}, {pipeline_mode = #tpu.pipeline_mode<synchronous>, transform_indices = @transform_4, window_bounds = array<i64: 1, 8>}, {pipeline_mode = #tpu.pipeline_mode<synchronous>, transform_indices = @transform_5, window_bounds = array<i64: 2, 8>}]} {
    %c0 = arith.constant 0 : index
    %c0_0 = arith.constant 0 : index
    %c0_1 = arith.constant 0 : index
    %0 = vector.load %arg2[%c0, %c0_0, %c0_1] : memref<2x4x256xf32, #tpu.memory_space<vmem>>, vector<2x4x256xf32>
    %c0_i32 = arith.constant 0 : i32
    %1 = arith.cmpi eq, %arg0, %c0_i32 : i32
    %2 = arith.extui %1 : i1 to i32
    %c0_i32_2 = arith.constant 0 : i32
    %3 = arith.cmpi ne, %2, %c0_i32_2 : i32
    scf.if %3 {
      %c0_i32_4 = arith.constant 0 : i32
      %7 = arith.cmpi eq, %arg1, %c0_i32_4 : i32
      %8 = arith.extui %7 : i1 to i32
      %c0_i32_5 = arith.constant 0 : i32
      %9 = arith.cmpi ne, %8, %c0_i32_5 : i32
      scf.if %9 {
        %cst_23 = arith.constant 0.000000e+00 : f32
        %28 = vector.broadcast %cst_23 : f32 to vector<1x4x1xf32>
        %c0_24 = arith.constant 0 : index
        %c0_25 = arith.constant 0 : index
        %c0_26 = arith.constant 0 : index
        %29 = vector.load %arg8[%c0_24, %c0_25, %c0_26] : memref<1x4x1xf32, #tpu.memory_space<vmem>>, vector<1x4x1xf32>
        tpu.vector_store %arg8[%c0_24, %c0_25, %c0_26], %28 {strides = array<i32>} : memref<1x4x1xf32, #tpu.memory_space<vmem>>, vector<1x4x1xf32>,
        %cst_27 = arith.constant 0.000000e+00 : f32
        %30 = vector.broadcast %cst_27 : f32 to vector<1x4x1xf32>
        %c0_28 = arith.constant 0 : index
        %c0_29 = arith.constant 0 : index
        %c0_30 = arith.constant 0 : index
        %31 = vector.load %arg9[%c0_28, %c0_29, %c0_30] : memref<1x4x1xf32, #tpu.memory_space<vmem>>, vector<1x4x1xf32>
        tpu.vector_store %arg9[%c0_28, %c0_29, %c0_30], %30 {strides = array<i32>} : memref<1x4x1xf32, #tpu.memory_space<vmem>>, vector<1x4x1xf32>,
      } else {
      }
      %cst = arith.constant dense<0.000000e+00> : vector<2x4xf32>
      %10 = vector.multi_reduction <add>, %0, %cst [2] : vector<2x4x256xf32> to vector<2x4xf32>
      %11 = vector.shape_cast %10 : vector<2x4xf32> to vector<2x4x1xf32>
      %12 = arith.mulf %0, %0 : vector<2x4x256xf32>
      %cst_6 = arith.constant dense<0.000000e+00> : vector<2x4xf32>
      %13 = vector.multi_reduction <add>, %12, %cst_6 [2] : vector<2x4x256xf32> to vector<2x4xf32>
      %14 = vector.shape_cast %13 : vector<2x4xf32> to vector<2x4x1xf32>
      %c0_7 = arith.constant 0 : index
      %c0_8 = arith.constant 0 : index
      %c0_9 = arith.constant 0 : index
      %15 = vector.load %arg8[%c0_7, %c0_8, %c0_9] : memref<1x4x1xf32, #tpu.memory_space<vmem>>, vector<1x4x1xf32>
      %cst_10 = arith.constant dense<0.000000e+00> : vector<4x1xf32>
      %16 = vector.multi_reduction <add>, %11, %cst_10 [0] : vector<2x4x1xf32> to vector<4x1xf32>
      %17 = vector.shape_cast %16 : vector<4x1xf32> to vector<1x4x1xf32>
      %18 = arith.addf %15, %17 : vector<1x4x1xf32>
      %c0_11 = arith.constant 0 : index
      %c0_12 = arith.constant 0 : index
      %c0_13 = arith.constant 0 : index
      %19 = vector.load %arg8[%c0_11, %c0_12, %c0_13] : memref<1x4x1xf32, #tpu.memory_space<vmem>>, vector<1x4x1xf32>
      tpu.vector_store %arg8[%c0_11, %c0_12, %c0_13], %18 {strides = array<i32>} : memref<1x4x1xf32, #tpu.memory_space<vmem>>, vector<1x4x1xf32>,
      %c0_14 = arith.constant 0 : index
      %c0_15 = arith.constant 0 : index
      %c0_16 = arith.constant 0 : index
      %20 = vector.load %arg9[%c0_14, %c0_15, %c0_16] : memref<1x4x1xf32, #tpu.memory_space<vmem>>, vector<1x4x1xf32>
      %cst_17 = arith.constant dense<0.000000e+00> : vector<4x1xf32>
      %21 = vector.multi_reduction <add>, %14, %cst_17 [0] : vector<2x4x1xf32> to vector<4x1xf32>
      %22 = vector.shape_cast %21 : vector<4x1xf32> to vector<1x4x1xf32>
      %23 = arith.addf %20, %22 : vector<1x4x1xf32>
      %c0_18 = arith.constant 0 : index
      %c0_19 = arith.constant 0 : index
      %c0_20 = arith.constant 0 : index
      %24 = vector.load %arg9[%c0_18, %c0_19, %c0_20] : memref<1x4x1xf32, #tpu.memory_space<vmem>>, vector<1x4x1xf32>
      tpu.vector_store %arg9[%c0_18, %c0_19, %c0_20], %23 {strides = array<i32>} : memref<1x4x1xf32, #tpu.memory_space<vmem>>, vector<1x4x1xf32>,
      %c0_i32_21 = arith.constant 0 : i32
      %25 = arith.cmpi eq, %arg1, %c0_i32_21 : i32
      %26 = arith.extui %25 : i1 to i32
      %c0_i32_22 = arith.constant 0 : i32
      %27 = arith.cmpi ne, %26, %c0_i32_22 : i32
      scf.if %27 {
        %c0_23 = arith.constant 0 : index
        %c0_24 = arith.constant 0 : index
        %c0_25 = arith.constant 0 : index
        %28 = vector.load %arg8[%c0_23, %c0_24, %c0_25] : memref<1x4x1xf32, #tpu.memory_space<vmem>>, vector<1x4x1xf32>
        %cst_26 = arith.constant 0.001953125 : f32
        %29 = vector.broadcast %cst_26 : f32 to vector<1x4x1xf32>
        %30 = arith.mulf %28, %29 : vector<1x4x1xf32>
        %c0_27 = arith.constant 0 : index
        %c0_28 = arith.constant 0 : index
        %c0_29 = arith.constant 0 : index
        %31 = vector.load %arg9[%c0_27, %c0_28, %c0_29] : memref<1x4x1xf32, #tpu.memory_space<vmem>>, vector<1x4x1xf32>
        %cst_30 = arith.constant 0.001953125 : f32
        %32 = vector.broadcast %cst_30 : f32 to vector<1x4x1xf32>
        %33 = arith.mulf %31, %32 : vector<1x4x1xf32>
        %34 = arith.mulf %30, %30 : vector<1x4x1xf32>
        %35 = arith.subf %33, %34 : vector<1x4x1xf32>
        %cst_31 = arith.constant 0.000000e+00 : f32
        %36 = vector.broadcast %cst_31 : f32 to vector<1x4x1xf32>
        %37 = arith.maximumf %35, %36 : vector<1x4x1xf32>
        %cst_32 = arith.constant 9.99999974E-6 : f32
        %38 = vector.broadcast %cst_32 : f32 to vector<1x4x1xf32>
        %39 = arith.addf %37, %38 : vector<1x4x1xf32>
        %40 = math.rsqrt %39 : vector<1x4x1xf32>
        %c0_33 = arith.constant 0 : index
        %c0_34 = arith.constant 0 : index
        %c0_35 = arith.constant 0 : index
        %41 = vector.load %arg3[%c0_33, %c0_34, %c0_35] : memref<1x4x1xf32, #tpu.memory_space<vmem>>, vector<1x4x1xf32>
        %42 = arith.mulf %41, %40 : vector<1x4x1xf32>
        %c0_36 = arith.constant 0 : index
        %c0_37 = arith.constant 0 : index
        %c0_38 = arith.constant 0 : index
        %43 = vector.load %arg10[%c0_36, %c0_37, %c0_38] : memref<1x4x1xf32, #tpu.memory_space<vmem>>, vector<1x4x1xf32>
        tpu.vector_store %arg10[%c0_36, %c0_37, %c0_38], %42 {strides = array<i32>} : memref<1x4x1xf32, #tpu.memory_space<vmem>>, vector<1x4x1xf32>,
        %c0_39 = arith.constant 0 : index
        %c0_40 = arith.constant 0 : index
        %c0_41 = arith.constant 0 : index
        %44 = vector.load %arg4[%c0_39, %c0_40, %c0_41] : memref<1x4x1xf32, #tpu.memory_space<vmem>>, vector<1x4x1xf32>
        %45 = arith.mulf %30, %42 : vector<1x4x1xf32>
        %46 = arith.subf %44, %45 : vector<1x4x1xf32>
        %c0_42 = arith.constant 0 : index
        %c0_43 = arith.constant 0 : index
        %c0_44 = arith.constant 0 : index
        %47 = vector.load %arg11[%c0_42, %c0_43, %c0_44] : memref<1x4x1xf32, #tpu.memory_space<vmem>>, vector<1x4x1xf32>
        tpu.vector_store %arg11[%c0_42, %c0_43, %c0_44], %46 {strides = array<i32>} : memref<1x4x1xf32, #tpu.memory_space<vmem>>, vector<1x4x1xf32>,
      } else {
      }
    } else {
    }
    %c1_i32 = arith.constant 1 : i32
    %4 = arith.cmpi eq, %arg0, %c1_i32 : i32
    %5 = arith.extui %4 : i1 to i32
    %c0_i32_3 = arith.constant 0 : i32
    %6 = arith.cmpi ne, %5, %c0_i32_3 : i32
    scf.if %6 {
      %c0_i32_4 = arith.constant 0 : i32
      %7 = arith.cmpi eq, %arg1, %c0_i32_4 : i32
      %8 = arith.extui %7 : i1 to i32
      %c0_i32_5 = arith.constant 0 : i32
      %9 = arith.cmpi ne, %8, %c0_i32_5 : i32
      scf.if %9 {
        %cst_19 = arith.constant 0.000000e+00 : f32
        %25 = vector.broadcast %cst_19 : f32 to vector<2x4xf32>
        %c0_20 = arith.constant 0 : index
        %c0_21 = arith.constant 0 : index
        %26 = vector.load %arg12[%c0_20, %c0_21] : memref<2x4xf32, #tpu.memory_space<vmem>>, vector<2x4xf32>
        tpu.vector_store %arg12[%c0_20, %c0_21], %25 {strides = array<i32>} : memref<2x4xf32, #tpu.memory_space<vmem>>, vector<2x4xf32>,
      } else {
      }
      %c0_6 = arith.constant 0 : index
      %c0_7 = arith.constant 0 : index
      %c0_8 = arith.constant 0 : index
      %10 = vector.load %arg10[%c0_6, %c0_7, %c0_8] : memref<1x4x1xf32, #tpu.memory_space<vmem>>, vector<1x4x1xf32>
      %11 = vector.broadcast %10 : vector<1x4x1xf32> to vector<2x4x256xf32>
      %12 = arith.mulf %0, %11 : vector<2x4x256xf32>
      %c0_9 = arith.constant 0 : index
      %c0_10 = arith.constant 0 : index
      %c0_11 = arith.constant 0 : index
      %13 = vector.load %arg11[%c0_9, %c0_10, %c0_11] : memref<1x4x1xf32, #tpu.memory_space<vmem>>, vector<1x4x1xf32>
      %14 = vector.broadcast %13 : vector<1x4x1xf32> to vector<2x4x256xf32>
      %15 = arith.addf %12, %14 : vector<2x4x256xf32>
      %cst = arith.constant 0.000000e+00 : f32
      %16 = vector.broadcast %cst : f32 to vector<2x4x256xf32>
      %17 = arith.maximumf %15, %16 : vector<2x4x256xf32>
      %c0_12 = arith.constant 0 : index
      %c0_13 = arith.constant 0 : index
      %18 = vector.load %arg12[%c0_12, %c0_13] : memref<2x4xf32, #tpu.memory_space<vmem>>, vector<2x4xf32>
      %cst_14 = arith.constant dense<0.000000e+00> : vector<2x4xf32>
      %19 = vector.multi_reduction <add>, %17, %cst_14 [2] : vector<2x4x256xf32> to vector<2x4xf32>
      %20 = arith.addf %18, %19 : vector<2x4xf32>
      %c0_15 = arith.constant 0 : index
      %c0_16 = arith.constant 0 : index
      %21 = vector.load %arg12[%c0_15, %c0_16] : memref<2x4xf32, #tpu.memory_space<vmem>>, vector<2x4xf32>
      tpu.vector_store %arg12[%c0_15, %c0_16], %20 {strides = array<i32>} : memref<2x4xf32, #tpu.memory_space<vmem>>, vector<2x4xf32>,
      %c0_i32_17 = arith.constant 0 : i32
      %22 = arith.cmpi eq, %arg1, %c0_i32_17 : i32
      %23 = arith.extui %22 : i1 to i32
      %c0_i32_18 = arith.constant 0 : i32
      %24 = arith.cmpi ne, %23, %c0_i32_18 : i32
      scf.if %24 {
        %c0_19 = arith.constant 0 : index
        %c0_20 = arith.constant 0 : index
        %25 = vector.load %arg12[%c0_19, %c0_20] : memref<2x4xf32, #tpu.memory_space<vmem>>, vector<2x4xf32>
        %cst_21 = arith.constant 3.906250e-03 : f32
        %26 = vector.broadcast %cst_21 : f32 to vector<2x4xf32>
        %27 = arith.mulf %25, %26 : vector<2x4xf32>
        %c0_22 = arith.constant 0 : index
        %c0_23 = arith.constant 0 : index
        %28 = vector.load %arg5[%c0_22, %c0_23] : memref<4x8xf32, #tpu.memory_space<vmem>>, vector<4x8xf32>
        %cst_24 = arith.constant dense<0.000000e+00> : vector<2x8xf32>
        %29 = tpu.matmul %27, %28, %cst_24 {dimension_numbers = #tpu.dot_dimension_numbers<[1], [0], [0], [1], [0, 0, 1, 1], [], []>} : vector<2x4xf32>, vector<4x8xf32>, vector<2x8xf32> -> vector<2x8xf32>
        %c0_25 = arith.constant 0 : index
        %c0_26 = arith.constant 0 : index
        %30 = vector.load %arg6[%c0_25, %c0_26] : memref<1x8xf32, #tpu.memory_space<vmem>>, vector<1x8xf32>
        %31 = vector.broadcast %30 : vector<1x8xf32> to vector<2x8xf32>
        %32 = arith.addf %29, %31 : vector<2x8xf32>
        %c0_27 = arith.constant 0 : index
        %c0_28 = arith.constant 0 : index
        %33 = vector.load %arg7[%c0_27, %c0_28] : memref<2x8xf32, #tpu.memory_space<vmem>>, vector<2x8xf32>
        tpu.vector_store %arg7[%c0_27, %c0_28], %32 {strides = array<i32>} : memref<2x8xf32, #tpu.memory_space<vmem>>, vector<2x8xf32>,
      } else {
      }
    } else {
    }
    return
  }
  func.func @transform_0(%arg0: i32, %arg1: i32) -> (i32, i32, i32) {
    %c0_i32 = arith.constant 0 : i32
    %c0_i32_0 = arith.constant 0 : i32
    %c0_i32_1 = arith.constant 0 : i32
    return %c0_i32, %c0_i32_0, %arg1 : i32, i32, i32
  }
  func.func @transform_1(%arg0: i32, %arg1: i32) -> (i32, i32, i32) {
    %c0_i32 = arith.constant 0 : i32
    %c0_i32_0 = arith.constant 0 : i32
    %c0_i32_1 = arith.constant 0 : i32
    %c0_i32_2 = arith.constant 0 : i32
    return %c0_i32, %c0_i32_0, %c0_i32_1 : i32, i32, i32
  }
  func.func @transform_2(%arg0: i32, %arg1: i32) -> (i32, i32, i32) {
    %c0_i32 = arith.constant 0 : i32
    %c0_i32_0 = arith.constant 0 : i32
    %c0_i32_1 = arith.constant 0 : i32
    %c0_i32_2 = arith.constant 0 : i32
    return %c0_i32, %c0_i32_0, %c0_i32_1 : i32, i32, i32
  }
  func.func @transform_3(%arg0: i32, %arg1: i32) -> (i32, i32) {
    %c0_i32 = arith.constant 0 : i32
    %c0_i32_0 = arith.constant 0 : i32
    %c0_i32_1 = arith.constant 0 : i32
    return %c0_i32, %c0_i32_0 : i32, i32
  }
  func.func @transform_4(%arg0: i32, %arg1: i32) -> (i32, i32) {
    %c0_i32 = arith.constant 0 : i32
    %c0_i32_0 = arith.constant 0 : i32
    %c0_i32_1 = arith.constant 0 : i32
    return %c0_i32, %c0_i32_0 : i32, i32
  }
  func.func @transform_5(%arg0: i32, %arg1: i32) -> (i32, i32) {
    %c0_i32 = arith.constant 0 : i32
    %c0_i32_0 = arith.constant 0 : i32
    %c0_i32_1 = arith.constant 0 : i32
    return %c0_i32, %c0_i32_0 : i32, i32
  }
}

</mosaic_0001>

<bundles_post_ra>
// kernel: tpu_custom_call.1
= control target key start
LH: loop header
LB: loop body
LE: loop exit
PB: predicated region body
PF: predicated region fallthrough
CT: control target
= control target key end

     0   :  { %10 = vsyncpa [#allocation8], 0  ;;  %s1246_s0 = inlined_call_operand.hbm [shape: f32[2,4,256], index: 0, kind: input, shape index: {}]   ;;  %s1247_s1 = inlined_call_operand.hbm [shape: f32[1,4,1], index: 1, kind: input, shape index: {}]   ;;  %s1248_s2 = inlined_call_operand.hbm [shape: f32[1,4,1], index: 2, kind: input, shape index: {}]   ;;  %s1249_s3 = inlined_call_operand.hbm [shape: f32[4,8], index: 3, kind: input, shape index: {}]   ;;  %s1250_s4 = inlined_call_operand.hbm [shape: f32[1,8], index: 4, kind: input, shape index: {}]   ;;  %s1251_s5 = inlined_call_operand.hbm [shape: f32[2,8], index: 5, kind: output, shape index: {}]  }
   0x1   :  { %11 = vsyncpa [#allocation11], 0 }
   0x2   :  { %12 = vsyncpa [#allocation14], 0 }
   0x3   :  { %13 = vsyncpa [#allocation9], 0  ;;  %s992_s18 = smov 0   ;;  %s994_s19 = smov 0  }
   0x4   :  { %s996_s20 = smov 0  }
   0x5 LB: > { %s949_s21 = smov [#allocation10]   ;;  %s622_s23 = sadd.s32 4294967295, %s947_s20   ;;  %s947_s20 = sphi %s996_s20, %s19_s20   ;;  %s943_s19 = sphi %s994_s19, %s1265_s19   ;;  %s939_s18 = sphi %s992_s18, %s1264_s18  }
   0x6   : > { %s196_s22 = sshll.u32 %s949_s21, 4  ;;  %p623_p0 = scmp.ge.s32.totalorder %s947_s20, 1  ;;  %s197_s22 = int_to_ptr.vmem [resolvable:$true] %s196_s22 }
   0x7   : > { %p167_p1 = scmp.lt.s32.totalorder %s947_s20, 3  ;;  %p1012_p2 = scmp.eq.s32.totalorder %s622_s23, 0 }
   0x8   : > { %s950_s26 = smov [#allocation13]   ;;  %s31_s29 = sadd.s32 1, %s943_s19 }
   0x9   : > { %s1255_s24 = scalar_select %p1012_p2, 1, 0 }
   0xa   : > { %p1016_p3 = pnand %p623_p0, %p167_p1  ;;  %s218_s27 = sshll.u32 %s950_s26, 4  ;;  %s1022_s27 = int_to_ptr.vmem [resolvable:$true] %s218_s27 }
   0xb   : > { %p1033_p6 = scmp.ge.s32.totalorder %s31_s29, 2  ;;  %s743_s8 = scalar_lea.hbm %s1247_s1, 64 }
   0xc   : > { %s1256_s25 = scalar_select %p1016_p3, 1, 0 }
   0xd   : > { %p675_p4 = pneg %p1016_p3  ;;  %p744_p7 = scmp.ne.s32.totalorder %s1247_s1, %s743_s8 }
   0xe   : > { %s1258_s30 = scalar_select %p1033_p6, 1, 0 }
   0xf   : > { %p1026_p5 = pnand %p1012_p2, %p675_p4  ;;  %p750_p11 = scmp.lt.u32.totalorder %s743_s8, %s1247_s1 }
  0x11   : > { %p1045_p8 = pneg %p1026_p5 }
  0x13   : > { %p746_p9 = pnand %p1045_p8, %p744_p7 }
  0x15   : > { %p747_p10 = pneg %p746_p9 }
  0x17   : > { %p752_p12 = pnand %p750_p11, %p747_p10 }
  0x19   : > { %755 = shalt.err (!%p752_p12)
}
  0x1a   : > { %s756_s14 = scalar_lea.vmem %s197_s22, 64  ;;  %p764_p4 = scmp.lt.s32.totalorder %s197_s22, %s197_s22 }
  0x1b   : > { %p757_p13 = scmp.ne.s32.totalorder %s197_s22, %s756_s14  ;;  %p765_p2 = scmp.lt.s32.totalorder %s756_s14, %s756_s14 }
  0x1d   : > { %p759_p0 = pnand %p757_p13, %p1045_p8  ;;  %p766_p3 = por %p765_p2, %p764_p4 }
  0x1f   : > { %p760_p1 = pneg %p759_p0 }
  0x21   : > { %p767_p6 = pnand %p766_p3, %p760_p1 }
  0x23   : > { %770 = shalt.err (!%p767_p6)
}
  0x24   : > { %681 = dma.hbm_to_vmem [thread:$0]  (!%p1026_p5), %s1247_s1, 64, %s197_s22, [#allocation11]  }
  0x25   : > { %s771_s26 = scalar_lea.hbm %s1249_s3, 64 }
  0x26   : > { %p772_p7 = scmp.ne.s32.totalorder %s1249_s3, %s771_s26  ;;  %p778_p3 = scmp.lt.u32.totalorder %s771_s26, %s1249_s3 }
  0x28   : > { %p774_p9 = pnand %p772_p7, %p1045_p8 }
  0x2a   : > { %p775_p2 = pneg %p774_p9 }
  0x2c   : > { %p780_p6 = pnand %p778_p3, %p775_p2 }
  0x2e   : > { %783 = shalt.err (!%p780_p6)
}
  0x2f   : > { %s784_s22 = scalar_lea.vmem %s1022_s27, 64  ;;  %p792_p13 = scmp.lt.s32.totalorder %s1022_s27, %s1022_s27 }
  0x30   : > { %p785_p10 = scmp.ne.s32.totalorder %s1022_s27, %s784_s22  ;;  %p793_p0 = scmp.lt.s32.totalorder %s784_s22, %s784_s22 }
  0x32   : > { %p787_p11 = pnand %p785_p10, %p1045_p8  ;;  %p794_p1 = por %p793_p0, %p792_p13 }
  0x34   : > { %p788_p12 = pneg %p787_p11 }
  0x36   : > { %p795_p4 = pnand %p794_p1, %p788_p12 }
  0x38   : > { %798 = shalt.err (!%p795_p4)
}
  0x39   : > { %687 = dma.hbm_to_vmem [thread:$0]  (!%p1026_p5), %s1249_s3, 64, %s1022_s27, [#allocation14]  }
  0x3a   : > { %p1260_p7 = scmp.ne.s32.totalorder %s1258_s30, 0  ;;  %s951_s13 = smov [#allocation7]  }
  0x3b   : > { %s182_s14 = sshll.u32 %s951_s13, 4  ;;  %s799_s17 = scalar_lea.hbm %s1246_s0, 256  ;;  %s183_s14 = int_to_ptr.vmem [resolvable:$true] %s182_s14 }
  0x3c   : > { %s1267_s29 = smov (%p1260_p7, %s31_s29), 0  ;;  %p800_p9 = scmp.ne.s32.totalorder %s1246_s0, %s799_s17 }
  0x3d   : > { %p806_p6 = scmp.lt.u32.totalorder %s799_s17, %s1246_s0 }
  0x3e   : > { %p802_p2 = pnand %p800_p9, %p1045_p8 }
  0x40   : > { %p803_p3 = pneg %p802_p2 }
  0x42   : > { %p808_p10 = pnand %p806_p6, %p803_p3 }
  0x44   : > { %811 = shalt.err (!%p808_p10)
}
  0x45   : > { %s812_s30 = scalar_lea.vmem %s183_s14, 256  ;;  %p820_p0 = scmp.lt.s32.totalorder %s183_s14, %s183_s14 }
  0x46   : > { %p813_p11 = scmp.ne.s32.totalorder %s183_s14, %s812_s30  ;;  %p821_p1 = scmp.lt.s32.totalorder %s812_s30, %s812_s30 }
  0x48   : > { %p815_p12 = pnand %p813_p11, %p1045_p8  ;;  %p822_p4 = por %p821_p1, %p820_p0 }
  0x4a   : > { %p816_p13 = pneg %p815_p12 }
  0x4c   : > { %p823_p7 = pnand %p822_p4, %p816_p13 }
  0x4e   : > { %826 = shalt.err (!%p823_p7)
}
  0x4f   : > { %s952_s7 = smov 128   ;;  %s953_s8 = smov 8  }
  0x50   : > { %678 = dma.hbm_to_vmem [thread:$0]  (!%p1026_p5), %s1246_s0, 256, %s183_s14, [#allocation8], %s952_s7, %s952_s7, %s953_s8  }
  0x51   : > { %s954_s10 = smov [#allocation12]   ;;  %s955_s13 = smov [#allocation15]  }
  0x52   : > { %s207_s12 = sshll.u32 %s954_s10, 4  ;;  %s229_s15 = sshll.u32 %s955_s13, 4  ;;  %s208_s12 = int_to_ptr.vmem [resolvable:$true] %s207_s12  ;;  %s1108_s15 = int_to_ptr.vmem [resolvable:$true] %s229_s15 }
  0x53   : > { %s827_s21 = scalar_lea.hbm %s1248_s2, 64 }
  0x54   : > { %p828_p9 = scmp.ne.s32.totalorder %s1248_s2, %s827_s21  ;;  %p834_p6 = scmp.lt.u32.totalorder %s827_s21, %s1248_s2 }
  0x56   : > { %p830_p2 = pnand %p828_p9, %p1045_p8 }
  0x58   : > { %p831_p3 = pneg %p830_p2 }
  0x5a   : > { %p836_p10 = pnand %p834_p6, %p831_p3 }
  0x5c   : > { %839 = shalt.err (!%p836_p10)
}
  0x5d   : > { %s840_s30 = scalar_lea.vmem %s208_s12, 64  ;;  %p848_p0 = scmp.lt.s32.totalorder %s208_s12, %s208_s12 }
  0x5e   : > { %p841_p11 = scmp.ne.s32.totalorder %s208_s12, %s840_s30  ;;  %p849_p1 = scmp.lt.s32.totalorder %s840_s30, %s840_s30 }
  0x60   : > { %p843_p12 = pnand %p841_p11, %p1045_p8  ;;  %p850_p4 = por %p849_p1, %p848_p0 }
  0x62   : > { %p844_p13 = pneg %p843_p12 }
  0x64   : > { %p851_p7 = pnand %p850_p4, %p844_p13 }
  0x66   : > { %854 = shalt.err (!%p851_p7)
}
  0x67   : > { %684 = dma.hbm_to_vmem [thread:$0]  (!%p1026_p5), %s1248_s2, 64, %s208_s12, [#allocation11]  }
  0x68   : > { %s855_s10 = scalar_lea.hbm %s1250_s4, 16 }
  0x69   : > { %p856_p9 = scmp.ne.s32.totalorder %s1250_s4, %s855_s10  ;;  %p862_p6 = scmp.lt.u32.totalorder %s855_s10, %s1250_s4 }
  0x6b   : > { %p858_p2 = pnand %p856_p9, %p1045_p8 }
  0x6d   : > { %p859_p3 = pneg %p858_p2 }
  0x6f   : > { %p864_p10 = pnand %p862_p6, %p859_p3 }
  0x71   : > { %867 = shalt.err (!%p864_p10)
}
  0x72   : > { %s868_s12 = scalar_lea.vmem %s1108_s15, 16  ;;  %s875_s26 = scalar_lea.vmem %s1108_s15, 32 }
  0x73   : > { %p869_p11 = scmp.ne.s32.totalorder %s1108_s15, %s868_s12  ;;  %p876_p0 = scmp.lt.s32.totalorder %s1108_s15, %s1108_s15 }
  0x74   : > { %p877_p1 = scmp.lt.s32.totalorder %s875_s26, %s868_s12 }
  0x75   : > { %p871_p12 = pnand %p869_p11, %p1045_p8 }
  0x76   : > { %p878_p4 = por %p877_p1, %p876_p0 }
  0x77   : > { %p872_p13 = pneg %p871_p12 }
  0x79   : > { %p879_p7 = pnand %p878_p4, %p872_p13 }
  0x7b   : > { %882 = shalt.err (!%p879_p7)
}
  0x7c   : > { %690 = dma.hbm_to_vmem [thread:$0]  (!%p1026_p5), %s1250_s4, 16, %s1108_s15, [#allocation14]  }
  0x7d   : > { %p1261_p9 = scmp.ne.s32.totalorder %s1256_s25, 0 }
  0x7e   : > { %p1262_p8 = scmp.ne.s32.totalorder (!%p1261_p9), %s1255_s24, 0 }
  0x7f   : > { %242 = sbr.rel (%p1261_p9) target bundleno = 879 (0x36f), region = 40 }
  0x86   : > { %922 = dma.done.wait (%p1262_p8), [#allocation8], 256  }
  0x87   : > { %924 = vsyncadd (%p1262_p8), [#allocation8], 4294967040 }
  0x88   : > { %926 = dma.done.wait (%p1262_p8), [#allocation11], 128  }
  0x89   : > { %928 = vsyncadd (%p1262_p8), [#allocation11], 4294967168 }
  0x8a   : > { %930 = dma.done.wait (%p1262_p8), [#allocation14], 80  }
  0x8b   : > { %932 = vsyncadd (%p1262_p8), [#allocation14], 4294967216  ;;  %v1166_v0 = vld [vmem:[#allocation7] sm:$0xff]  ;;  %v1168_v1 = vld [vmem:[#allocation7 + $0x8] sm:$0xff]  ;;  %p635_p5 = scmp.ne.s32.totalorder %s939_s18, 0 }
  0x8c   : > { %v292_v2 = vcombine.high (!%p635_p5), %v1166_v0, %v1166_v0  ;;  %vm296_vm0 = vcmask (!%p635_p5), 1043456   ;;  %v307_v3 = vmul.f32 (!%p635_p5), %v1166_v0, %v1166_v0  ;;  %v293_v4 = vcombine.high (!%p635_p5), %v1168_v1, %v1168_v1  ;;  %v350_v43 = vld [vmem:[#allocation10] sm:$0xf] (!%p635_p5)  ;;  %v353_v46 = vld [vmem:[#allocation12] sm:$0xf] (!%p635_p5) }
  0x8d   : > { %282 = sbr.rel (%p635_p5) target bundleno = 332 (0x14c), region = 64  ;;  %v297_v5 = vsel (!%p635_p5), %vm296_vm0, %v1166_v0, 0.0  ;;  %v302_v6 = vsel (!%p635_p5), %vm296_vm0, %v1168_v1, 0.0  ;;  %v308_v7 = vmul.f32 (!%p635_p5), %v1168_v1, %v1168_v1  ;;  %vm287_vm1 = vcmask (!%p635_p5), 3072  }
  0x8e   : > { %v298_v8 = vsel (!%p635_p5), %vm296_vm0, %v292_v2, 0.0  ;;  %v311_v9 = vcombine.high (!%p635_p5), %v307_v3, %v307_v3  ;;  %v315_v10 = vsel (!%p635_p5), %vm296_vm0, %v307_v3, 0.0  ;;  %v303_v11 = vsel (!%p635_p5), %vm296_vm0, %v293_v4, 0.0 }
  0x8f   : > { %v299_v12 = vadd.f32 (!%p635_p5), %v298_v8, %v297_v5  ;;  %v312_v13 = vcombine.high (!%p635_p5), %v308_v7, %v308_v7  ;;  %v320_v15 = vsel (!%p635_p5), %vm296_vm0, %v308_v7, 0.0  ;;  %v304_v17 = vadd.f32 (!%p635_p5), %v303_v11, %v302_v6 }
  0x90   : > { %v316_v14 = vsel (!%p635_p5), %vm296_vm0, %v311_v9, 0.0  ;;  %v956_v20 = vmov (!%p635_p5), 0.0  }
  0x91   : > { %300 = vadd.xlane.f32.xlu0 (!%p635_p5), %v299_v12  ;;  %v317_v16 = vadd.f32 (!%p635_p5), %v316_v14, %v315_v10  ;;  %v321_v18 = vsel (!%p635_p5), %vm296_vm0, %v312_v13, 0.0  ;;  %288 = vst.msk [vmem:[#allocation2] sm:$0xf] (!%p635_p5), %vm287_vm1, %v956_v20  ;;  %289 = vst.msk [vmem:[#allocation3] sm:$0xf] (!%p635_p5), %vm287_vm1, %v956_v20 }
  0x92   : > { %v322_v19 = vadd.f32 (!%p635_p5), %v321_v18, %v320_v15 }
  0x93   : > { %318 = vadd.xlane.f32.xlu1 (!%p635_p5), %v317_v16 }
  0x95   : > { %305 = vadd.xlane.f32.xlu0 %v304_v17 }
  0x97   : > { %323 = vadd.xlane.f32.xlu1 %v322_v19 }
  0x98   : > { %v325_v25 = vld [vmem:[#allocation2] sm:$0xf]  ;;  %v332_v30 = vld [vmem:[#allocation3] sm:$0xf] }
 0x11e   : > { %v301_v21 = vpop.xlane.xlu0 %300 }
 0x11f   : > { %v326_v24 = vsel %vm296_vm0, %v301_v21, 0.0 }
 0x120   : > { %v319_v22 = vpop.xlane.xlu1 %318 }
 0x121   : > { %v333_v29 = vsel %vm296_vm0, %v319_v22, 0.0 }
 0x122   : > { %v306_v23 = vpop.xlane.xlu0 %305 }
 0x123   : > { %v327_v26 = vsel %vm296_vm0, %v306_v23, 0.0 }
 0x124   : > { %v328_v27 = vadd.f32 %v327_v26, %v326_v24  ;;  %v324_v28 = vpop.xlane.xlu1 %323 }
 0x125   : > { %v334_v31 = vsel %vm296_vm0, %v324_v28, 0.0 }
 0x126   : > { %v329_v32 = vadd.f32 %v328_v27, %v325_v25  ;;  %v335_v33 = vadd.f32 %v334_v31, %v333_v29 }
 0x128   : > { %331 = vst.msk [vmem:[#allocation2] sm:$0xf] %vm287_vm1, %v329_v32  ;;  %v336_v34 = vadd.f32 %v335_v33, %v332_v30 }
 0x12a   : > { %337 = vst.msk [vmem:[#allocation3] sm:$0xf] %vm287_vm1, %v336_v34 }
 0x12f   : > { %v341_v35 = vld [vmem:[#allocation2] sm:$0xf] }
 0x130   : > { %v342_v36 = vmul.f32 0.001953125, %v341_v35 }
 0x131   : > { %v343_v37 = vld [vmem:[#allocation3] sm:$0xf] }
 0x132   : > { %v345_v38 = vmul.f32 %v342_v36, %v342_v36  ;;  %v344_v39 = vmul.f32 0.001953125, %v343_v37 }
 0x134   : > { %v346_v40 = vsub.f32 %v344_v39, %v345_v38 }
 0x136   : > { %v347_v41 = vmax.f32 %v346_v40, 0.0 }
 0x138   : > { %v348_v42 = vadd.f32 1e-05, %v347_v41 }
 0x13a   : > { %740 = vrsqrt.f32 %v348_v42 }
 0x144   : > { %v741_v44 = vpop.eup %740 }
 0x145   : > { %v351_v45 = vmul.f32 %v741_v44, %v350_v43 }
 0x147   : > { %352 = vst.msk [vmem:[#allocation4] sm:$0xf] %vm287_vm1, %v351_v45  ;;  %v354_v47 = vmul.f32 %v351_v45, %v342_v36 }
 0x149   : > { %v355_v48 = vsub.f32 %v353_v46, %v354_v47 }
 0x14b   : > { %356 = vst.msk [vmem:[#allocation5] sm:$0xf] %vm287_vm1, %v355_v48 }
 0x14c PF: > { %p636_p2 = scmp.ne.s32.totalorder %s939_s18, 1 }
 0x14d   : > { %v957_v50 = vmov (!%p636_p2), 0   ;;  %v375_v52 = vlaneseq (!%p636_p2)  ;;  %v958_v56 = vmov (!%p636_p2), 839922192   ;;  %vm406_vm2 = vcmask (!%p636_p2), 1043456   ;;  %v440_v15 = vld [vmem:[#allocation13] sm:$0xf] (!%p636_p2) }
 0x14e   : > { %360 = sbr.rel (%p636_p2) target bundleno = 854 (0x356), region = 76  ;;  %v367_v49 = vld [vmem:[#allocation4] sm:$0xf] (!%p636_p2)  ;;  %742 = vset.pattern.permute.xlu0 (!%p636_p2), %v957_v50  ;;  %v373_v57 = vunpack.c.l.s4 (!%p636_p2), %v958_v56  ;;  %vm365_vm3 = vcmask (!%p636_p2), 25600   ;;  %vm960_vm4 = vmmov (!%p636_p2), 0   ;;  %vm429_vm5 = vcmask (!%p636_p2), 1041409  }
 0x14f   : > { %370 = vperm.xlu0 (!%p636_p2), %742, %v367_v49   ;;  %v376_v53 = vshrl.u32 (!%p636_p2), %v375_v52, 7  ;;  %v420_v54 = vand.u32 (!%p636_p2), 127, %v375_v52  ;;  %vm448_vm6 = vcmask (!%p636_p2), 31744   ;;  %v637_v25 = vld [vmem:[#allocation15] ss:$0 sm:$0xff] (!%p636_p2)  ;;  %vm525_vm7 = vcmask (!%p636_p2), 58368  }
 0x150   : > { %v374_v58 = vunpack.c.0.s8 (!%p636_p2), %v373_v57 }
 0x151   : > { %v423_v55 = vsub.s32 (!%p636_p2), %v420_v54, %v376_v53 }
 0x152   : > { %v382_v51 = vld [vmem:[#allocation5] sm:$0xf] (!%p636_p2)  ;;  %v377_v59 = vsub.s32 (!%p636_p2), %v374_v58, %v376_v53 }
 0x153   : > { %385 = vperm.xlu0 (!%p636_p2), %742, %v382_v51  }
 0x1ce   : > { %v371_v60 = vpop.permute.xlu0 %370 }
 0x1cf   : > { %v378_v61 = vrot.slane %v371_v60, %v377_v59 }
 0x1d1   : > { %v380_v63 = vmul.f32 %v378_v61, %v1166_v0  ;;  %v381_v2 = vmul.f32 %v378_v61, %v1168_v1  ;;  %v959_v1 = vmov 0.0  }
 0x1d2   : > { %v386_v62 = vpop.permute.xlu0 %385  ;;  %366 = vst.msk [vmem:[#allocation6] sm:$0x3] %vm365_vm3, %v959_v1  ;;  %646 = vmatprep.subr.mxu0 %v959_v1  ;;  %648 = vmatprep.mubr.msk.f32.mxu0 %vm960_vm4, %v959_v1 }
 0x1d3   : > { %v393_v3 = vrot.slane %v386_v62, %v377_v59  ;;  %647 = vmatpush3.msk.msra.mxu0 %vm406_vm2, %v440_v15 }
 0x1d5   : > { %v395_v4 = vadd.f32 %v393_v3, %v380_v63  ;;  %v396_v5 = vadd.f32 %v393_v3, %v381_v2 }
 0x1d7   : > { %v398_v6 = vmax.f32 %v396_v5, 0.0  ;;  %v397_v7 = vmax.f32 %v395_v4, 0.0 }
 0x1d9   : > { %v402_v8 = vcombine.high %v397_v7, %v397_v7  ;;  %v403_v9 = vcombine.high %v398_v6, %v398_v6  ;;  %v407_v10 = vsel %vm406_vm2, %v397_v7, 0.0  ;;  %v412_v0 = vsel %vm406_vm2, %v398_v6, 0.0  ;;  %v399_v20 = vld [vmem:[#allocation6] sm:$0x3] }
 0x1db   : > { %v408_v11 = vsel %vm406_vm2, %v402_v8, 0.0  ;;  %v413_v13 = vsel %vm406_vm2, %v403_v9, 0.0 }
 0x1dc   : > { %v409_v12 = vadd.f32 %v408_v11, %v407_v10  ;;  %v414_v14 = vadd.f32 %v413_v13, %v412_v0 }
 0x1de   : > { %410 = vadd.xlane.f32.xlu1 %v409_v12 }
 0x1e2   : > { %415 = vadd.xlane.f32.xlu1 %v414_v14 }
 0x26b   : > { %v411_v16 = vpop.xlane.xlu1 %410 }
 0x26c   : > { %v424_v18 = vrot.slane %v411_v16, %v423_v55 }
 0x26f   : > { %v416_v17 = vpop.xlane.xlu1 %415 }
 0x270   : > { %v428_v19 = vrot.slane %v416_v17, %v423_v55 }
 0x272   : > { %v430_v21 = vsel %vm429_vm5, %v428_v19, %v424_v18 }
 0x273   : > { %v432_v22 = vadd.f32 %v430_v21, %v399_v20 }
 0x275   : > { %434 = vst.msk [vmem:[#allocation6] sm:$0x3] %vm365_vm3, %v432_v22 }
 0x27c   : > { %v438_v23 = vld [vmem:[#allocation6] sm:$0x3] }
 0x27d   : > { %v439_v24 = vmul.f32 0.00390625, %v438_v23 }
 0x27f   : > { %649 = vmatmul.mubr.msk.f32.vlgmr.msra.gmra.mrb[0].mxu0 %vm448_vm6, %v439_v24 }
 0x352   : > { %v521_v26 = vpop.f32.mrb[0].mxu0 }
 0x353   : > { %v522_v27 = vadd.f32 %v637_v25, %v521_v26  ;;  %v650_v28 = vpop.f32.mrb[1].mxu0 }
 0x355   : > { %526 = vst.msk [vmem:[#allocation16] sm:$0x3] %vm525_vm7, %v522_v27 }
 0x356 PF: > { %p1211_p3 = scmp.eq.s32.totalorder %s622_s23, 1  ;;  %s961_s24 = smov [#allocation16]  }
 0x357   : > { %s534_s25 = sshll.u32 %s961_s24, 4  ;;  %s535_s25 = int_to_ptr.vmem [resolvable:$true] %s534_s25 }
 0x358   : > { %s883_s28 = scalar_lea.vmem %s535_s25, 32  ;;  %p890_p12 = scmp.lt.s32.totalorder %s535_s25, %s535_s25 }
 0x359   : > { %p884_p6 = scmp.ne.s32.totalorder %s535_s25, %s883_s28  ;;  %p891_p13 = scmp.lt.s32.totalorder %s883_s28, %s883_s28 }
 0x35b   : > { %p885_p10 = pnand %p884_p6, %p1211_p3  ;;  %p892_p0 = por %p891_p13, %p890_p12 }
 0x35d   : > { %p886_p11 = pneg %p885_p10 }
 0x35f   : > { %p893_p1 = pnand %p892_p0, %p886_p11 }
 0x361   : > { %896 = shalt.err (!%p893_p1)
}
 0x362   : > { %s897_s23 = scalar_lea.hbm %s1251_s5, 32 }
 0x363   : > { %p898_p4 = scmp.ne.s32.totalorder %s1251_s5, %s897_s23  ;;  %p903_p8 = scmp.lt.u32.totalorder %s897_s23, %s1251_s5 }
 0x365   : > { %p899_p7 = pnand %p898_p4, %p1211_p3 }
 0x367   : > { %p900_p9 = pneg %p899_p7 }
 0x369   : > { %p905_p5 = pnand %p903_p8, %p900_p9 }
 0x36b   : > { %908 = shalt.err (!%p905_p5)
}
 0x36c   : > { %672 = dma.vmem_to_hbm [thread:$0]  (%p1211_p3), %s535_s25, 32, %s1251_s5, [#allocation9]  }
 0x36d   : > { %934 = dma.done.wait (%p1211_p3), [#allocation9], 32  }
 0x36e   : > { %936 = vsyncadd (%p1211_p3), [#allocation9], 4294967264 }
 0x36f PF: > { %s19_s20 = sadd.s32 1, %s947_s20   ;;  %s1264_s18 = smov %s943_s19 }
 0x370   : > { %p16_p2 = scmp.ge.s32.totalorder %s19_s20, 4   ;;  %s1265_s19 = smov %s1267_s29 }
 0x372   :  { %18 = sbr.rel (!%p16_p2) target bundleno = 5 (0x5), region = 110 }
 0x379   :  { %547 = vsyncpa [#allocation8], 1 }
 0x37a   :  { %549 = vsyncpa [#allocation8 + $0x1], 1 }
 0x37b   :  { %550 = vsyncpa [#allocation11], 1 }
 0x37c   :  { %551 = vsyncpa [#allocation14], 1 }
 0x37d   :  { %552 = vsyncpa [#allocation9], 1 }
 0x37e   :  { %554 = vsyncpa [#allocation9 + $0x1], 1 }

</bundles_post_ra>
